<compile_context>
chip_gen: v7x
topology: tpu7x:2x2x1
jax: 0.10.0
libtpu: 0.0.40
codegen_flags: <defaults>
</compile_context>

<pallas_src>
from functools import partial

import jax
import jax.numpy as jnp
from jax.experimental import pallas as pl
from jax.experimental.pallas import tpu as pltpu

LANE = 128


def mlp_kernel(x_ref, w1_ref, w23_ref, b_ref, o_ref):
    # hidden1: Linear (bf16 operands, f32 accumulate) + ReLU (f32 epilogue)
    h = jnp.dot(x_ref[...], w1_ref[...], preferred_element_type=jnp.float32)
    h = jnp.maximum(h + b_ref[0:1, :], 0.0)
    # hidden2: Linear + ReLU
    h = jnp.dot(h.astype(jnp.bfloat16), w23_ref[0],
                preferred_element_type=jnp.float32)
    h = jnp.maximum(h + b_ref[1:2, :], 0.0)
    # output: Linear + Sigmoid (lane-padded to P columns; unmasked full vst)
    o = jnp.dot(h.astype(jnp.bfloat16), w23_ref[1],
                preferred_element_type=jnp.float32)
    o_ref[...] = jax.nn.sigmoid(o + b_ref[2:3, :]).astype(o_ref.dtype)


def prepare_params(w1, b1, w2, b2, w3, b3):
    """One-time static prep (do NOT run per forward call):
    zero lane-pad everything to a common width P, cast matmul operands to
    bf16, stack w2/w3 and the three biases so the kernel takes 4 inputs."""
    n_features = w1.shape[0]
    n_h1, n_h2, n_out = w1.shape[1], w2.shape[1], w3.shape[1]
    P = max(pl.cdiv(d, LANE) * LANE for d in (n_h1, n_h2, n_out))

    def pad2(w, rows, cols):
        return jnp.pad(w, ((0, rows - w.shape[0]), (0, cols - w.shape[1])))

    def padb(b):
        b = b.reshape(-1)
        return jnp.pad(b, (0, P - b.shape[0]))

    w1p = pad2(w1, n_features, P).astype(jnp.bfloat16)        # (F, P)
    w2p = pad2(w2, P, P).astype(jnp.bfloat16)                 # (P, P)
    w3p = pad2(w3, P, P).astype(jnp.bfloat16)                 # (P, P)
    w23 = jnp.stack([w2p, w3p])                               # (2, P, P) bf16
    biases = jnp.stack([padb(b1), padb(b2), padb(b3)]).astype(jnp.float32)
    return w1p, w23, biases, n_out


@partial(jax.jit, static_argnames=("n_out",))
def mlp_forward(x, w1p, w23, biases, *, n_out):
    B = x.shape[0]
    P = w23.shape[-1]
    xb = x.astype(jnp.bfloat16)  # single fused cast under jit

    vmem = lambda: pl.BlockSpec(memory_space=pltpu.MemorySpace.VMEM)
    out_p = pl.pallas_call(
        mlp_kernel,
        out_shape=jax.ShapeDtypeStruct((B, P), jnp.float32),
        in_specs=[vmem() for _ in range(4)],
        out_specs=vmem(),
    )(xb, w1p, w23, biases)
    # Padded columns are sigmoid(0)=0.5; slice them away right here.
    return out_p[:, :n_out]


def init_params(key, n_features, n_hidden1, n_hidden2, n_output):
    # Deterministic init mimicking nn.Linear's uniform(-1/sqrt(in), 1/sqrt(in)).
    ks = jax.random.split(key, 6)

    def lin(kw, kb, fan_in, fan_out):
        bound = 1.0 / jnp.sqrt(fan_in)
        w = jax.random.uniform(kw, (fan_in, fan_out), jnp.float32, -bound, bound)
        b = jax.random.uniform(kb, (1, fan_out), jnp.float32, -bound, bound)
        return w, b

    w1, b1 = lin(ks[0], ks[1], n_features, n_hidden1)
    w2, b2 = lin(ks[2], ks[3], n_hidden1, n_hidden2)
    w3, b3 = lin(ks[4], ks[5], n_hidden2, n_output)
    return w1, b1, w2, b2, w3, b3


if __name__ == "__main__":
    key = jax.random.PRNGKey(0)
    n_features, n_hidden1, n_hidden2, n_output = 32, 64, 64, 16
    batch = 8

    kx, kp = jax.random.split(key)
    x = jax.random.normal(kx, (batch, n_features), jnp.float32)
    params = init_params(kp, n_features, n_hidden1, n_hidden2, n_output)

    # One-time weight preparation (hoisted out of the forward path).
    w1p, w23, biases, n_out = prepare_params(*params)

    out = jax.block_until_ready(mlp_forward(x, w1p, w23, biases, n_out=n_out))

    # Reference in plain f32 JAX (same semantics as the PyTorch module).
    # Kernel uses bf16 matmul operands (f32 accumulation), so tolerance is
    # loosened accordingly.
    w1, b1, w2, b2, w3, b3 = params
    h1 = jnp.maximum(x @ w1 + b1, 0.0)
    h2 = jnp.maximum(h1 @ w2 + b2, 0.0)
    ref = jax.nn.sigmoid(h2 @ w3 + b3)
    assert out.shape == (batch, n_output)
    assert jnp.allclose(out, ref, atol=2e-2, rtol=2e-2), float(
        jnp.max(jnp.abs(out - ref)))

    print("KERNEL_OK")
</pallas_src>

<mosaic_0001>
module attributes {stable_mosaic.version = 11 : i64} {
  func.func @mlp_kernel(%arg0: memref<8x32xbf16, #tpu.memory_space<vmem>>, %arg1: memref<32x128xbf16, #tpu.memory_space<vmem>>, %arg2: memref<2x128x128xbf16, #tpu.memory_space<vmem>>, %arg3: memref<3x128xf32, #tpu.memory_space<vmem>>, %arg4: memref<8x128xf32, #tpu.memory_space<vmem>>) attributes {dimension_semantics = [], scalar_prefetch = 0 : i64, scratch_operands = 0 : i64, tpu.core_type = #tpu.core_type<tc>} {
    %c0 = arith.constant 0 : index
    %c0_0 = arith.constant 0 : index
    %0 = vector.load %arg0[%c0, %c0_0] : memref<8x32xbf16, #tpu.memory_space<vmem>>, vector<8x32xbf16>
    %c0_1 = arith.constant 0 : index
    %c0_2 = arith.constant 0 : index
    %1 = vector.load %arg1[%c0_1, %c0_2] : memref<32x128xbf16, #tpu.memory_space<vmem>>, vector<32x128xbf16>
    %cst = arith.constant dense<0.000000e+00> : vector<8x128xf32>
    %2 = tpu.matmul %0, %1, %cst {dimension_numbers = #tpu.dot_dimension_numbers<[1], [0], [0], [1], [0, 0, 1, 1], [], []>} : vector<8x32xbf16>, vector<32x128xbf16>, vector<8x128xf32> -> vector<8x128xf32>
    %c0_3 = arith.constant 0 : index
    %c0_4 = arith.constant 0 : index
    %3 = vector.load %arg3[%c0_3, %c0_4] : memref<3x128xf32, #tpu.memory_space<vmem>>, vector<1x128xf32>
    %4 = vector.broadcast %3 : vector<1x128xf32> to vector<8x128xf32>
    %5 = arith.addf %2, %4 : vector<8x128xf32>
    %cst_5 = arith.constant 0.000000e+00 : f32
    %6 = vector.broadcast %cst_5 : f32 to vector<8x128xf32>
    %7 = arith.maximumf %5, %6 : vector<8x128xf32>
    %8 = arith.truncf %7 : vector<8x128xf32> to vector<8x128xbf16>
    %c0_6 = arith.constant 0 : index
    %c0_7 = arith.constant 0 : index
    %c0_8 = arith.constant 0 : index
    %9 = vector.load %arg2[%c0_6, %c0_7, %c0_8] : memref<2x128x128xbf16, #tpu.memory_space<vmem>>, vector<1x128x128xbf16>
    %10 = vector.shape_cast %9 : vector<1x128x128xbf16> to vector<128x128xbf16>
    %cst_9 = arith.constant dense<0.000000e+00> : vector<8x128xf32>
    %11 = tpu.matmul %8, %10, %cst_9 {dimension_numbers = #tpu.dot_dimension_numbers<[1], [0], [0], [1], [0, 0, 1, 1], [], []>} : vector<8x128xbf16>, vector<128x128xbf16>, vector<8x128xf32> -> vector<8x128xf32>
    %c1 = arith.constant 1 : index
    %c0_10 = arith.constant 0 : index
    %12 = vector.load %arg3[%c1, %c0_10] : memref<3x128xf32, #tpu.memory_space<vmem>>, vector<1x128xf32>
    %13 = vector.broadcast %12 : vector<1x128xf32> to vector<8x128xf32>
    %14 = arith.addf %11, %13 : vector<8x128xf32>
    %cst_11 = arith.constant 0.000000e+00 : f32
    %15 = vector.broadcast %cst_11 : f32 to vector<8x128xf32>
    %16 = arith.maximumf %14, %15 : vector<8x128xf32>
    %17 = arith.truncf %16 : vector<8x128xf32> to vector<8x128xbf16>
    %c1_12 = arith.constant 1 : index
    %c0_13 = arith.constant 0 : index
    %c0_14 = arith.constant 0 : index
    %18 = vector.load %arg2[%c1_12, %c0_13, %c0_14] : memref<2x128x128xbf16, #tpu.memory_space<vmem>>, vector<1x128x128xbf16>
    %19 = vector.shape_cast %18 : vector<1x128x128xbf16> to vector<128x128xbf16>
    %cst_15 = arith.constant dense<0.000000e+00> : vector<8x128xf32>
    %20 = tpu.matmul %17, %19, %cst_15 {dimension_numbers = #tpu.dot_dimension_numbers<[1], [0], [0], [1], [0, 0, 1, 1], [], []>} : vector<8x128xbf16>, vector<128x128xbf16>, vector<8x128xf32> -> vector<8x128xf32>
    %c2 = arith.constant 2 : index
    %c0_16 = arith.constant 0 : index
    %21 = vector.load %arg3[%c2, %c0_16] : memref<3x128xf32, #tpu.memory_space<vmem>>, vector<1x128xf32>
    %22 = vector.broadcast %21 : vector<1x128xf32> to vector<8x128xf32>
    %23 = arith.addf %20, %22 : vector<8x128xf32>
    %24 = arith.negf %23 : vector<8x128xf32>
    %25 = math.exp %24 : vector<8x128xf32>
    %cst_17 = arith.constant 1.000000e+00 : f32
    %26 = vector.broadcast %cst_17 : f32 to vector<8x128xf32>
    %27 = arith.addf %26, %25 : vector<8x128xf32>
    %28 = arith.divf %26, %27 : vector<8x128xf32>
    %c0_18 = arith.constant 0 : index
    %c0_19 = arith.constant 0 : index
    %29 = vector.load %arg4[%c0_18, %c0_19] : memref<8x128xf32, #tpu.memory_space<vmem>>, vector<8x128xf32>
    tpu.vector_store %arg4[%c0_18, %c0_19], %28 {strides = array<i32>} : memref<8x128xf32, #tpu.memory_space<vmem>>, vector<8x128xf32>,
    return
  }
}

</mosaic_0001>

<bundles_post_ra>
// kernel: mlp_forward.1
= control target key start
LH: loop header
LB: loop body
LE: loop exit
PB: predicated region body
PF: predicated region fallthrough
CT: control target
= control target key end

     0   :  { %9 = vsyncpa [#allocation3], 0  ;;  %s656_s0 = inlined_call_operand.vmem [shape: bf16[8,32], index: 0, kind: input, shape index: {}]   ;;  %s657_s1 = inlined_call_operand.hbm [shape: bf16[32,128], index: 1, kind: input, shape index: {}]   ;;  %s658_s2 = inlined_call_operand.hbm [shape: bf16[2,128,128], index: 2, kind: input, shape index: {}]   ;;  %s659_s3 = inlined_call_operand.vmem [shape: f32[3,128], index: 3, kind: input, shape index: {}]   ;;  %s660_s4 = inlined_call_operand.hbm [shape: f32[8,128], index: 4, kind: output, shape index: {}]  }
   0x1   :  { %10 = vsyncpa [#allocation6], 0 }
   0x2   :  { %11 = vsyncpa [#allocation4], 0  ;;  %s552_s15 = smov [#allocation2]   ;;  %s480_s19 = scalar_lea.hbm %s657_s1, 256 }
   0x3   :  { %s19_s16 = sshll.u32 %s552_s15, 4  ;;  %p481_p0 = scmp.ne.s32.totalorder %s657_s1, %s480_s19  ;;  %s20_s16 = int_to_ptr.vmem [resolvable:$true] %s19_s16 }
   0x4   :  { %p484_p1 = scmp.lt.u32.totalorder %s480_s19, %s657_s1 }
   0x6   :  { %p486_p2 = pnand %p484_p1, %p481_p0 }
   0x8   :  { %489 = shalt.err (!%p486_p2)
}
   0x9   :  { %s490_s24 = scalar_lea.vmem %s20_s16, 256  ;;  %p495_p4 = scmp.lt.s32.totalorder %s20_s16, %s20_s16 }
   0xa   :  { %p491_p3 = scmp.ne.s32.totalorder %s20_s16, %s490_s24  ;;  %p496_p5 = scmp.lt.s32.totalorder %s490_s24, %s490_s24 }
   0xc   :  { %p497_p6 = por %p496_p5, %p495_p4 }
   0xe   :  { %p498_p7 = pnand %p497_p6, %p491_p3 }
  0x10   :  { %501 = shalt.err (!%p498_p7)
}
  0x11   :  { %s553_s25 = smov 64   ;;  %s554_s26 = smov 4  }
  0x12   :  { %25 = dma.hbm_to_vmem [thread:$0]  %s657_s1, 256, %s20_s16, [#allocation3], %s553_s25, %s553_s25, %s554_s26  }
  0x13   :  { %s555_s29 = smov [#allocation5]   ;;  %s502_s7 = scalar_lea.hbm %s658_s2, 2048 }
  0x14   :  { %s31_s30 = sshll.u32 %s555_s29, 4  ;;  %p503_p8 = scmp.ne.s32.totalorder %s658_s2, %s502_s7  ;;  %s32_s30 = int_to_ptr.vmem [resolvable:$true] %s31_s30 }
  0x15   :  { %p506_p9 = scmp.lt.u32.totalorder %s502_s7, %s658_s2 }
  0x17   :  { %p508_p10 = pnand %p506_p9, %p503_p8 }
  0x19   :  { %511 = shalt.err (!%p508_p10)
}
  0x1a   :  { %s512_s12 = scalar_lea.vmem %s32_s30, 2048  ;;  %p517_p12 = scmp.lt.s32.totalorder %s32_s30, %s32_s30 }
  0x1b   :  { %p513_p11 = scmp.ne.s32.totalorder %s32_s30, %s512_s12  ;;  %p518_p13 = scmp.lt.s32.totalorder %s512_s12, %s512_s12 }
  0x1d   :  { %p519_p0 = por %p518_p13, %p517_p12 }
  0x1f   :  { %p520_p1 = pnand %p519_p0, %p513_p11 }
  0x21   :  { %523 = shalt.err (!%p520_p1)
}
  0x22   :  { %37 = dma.hbm_to_vmem [thread:$0]  %s658_s2, 2048, %s32_s30, [#allocation6], %s553_s25, %s553_s25, %s554_s26  }
  0x23   :  { %546 = dma.done.wait [#allocation3], 256  }
  0x24   :  { %547 = vsyncadd [#allocation3], 4294967040 }
  0x25   :  { %548 = dma.done.wait [#allocation6], 2048  }
  0x26   :  { %549 = vsyncadd [#allocation6], 4294965248  ;;  %v556_v0 = vmov 0.0   ;;  %vm557_vm0 = vmmov 0   ;;  %v458_v1 = vld [vmem:[#allocation2] sm:$0xff]   ;;  %v459_v2 = vld [vmem:[#allocation2 + $0x8] sm:$0xff]  }
  0x27   :  { %403 = vmatprep.subr.bf16.mxu0 %v556_v0  ;;  %407 = vmatprep.mubr.msk.bf16.mxu0 %vm557_vm0, %v556_v0  ;;  %v460_v3 = vld [vmem:[#allocation5] sm:$0xff]   ;;  %vm69_vm1 = vcmask 261120   ;;  %v461_v4 = vld [vmem:[#allocation5 + $0x8] sm:$0xff]   ;;  %v462_v6 = vld [vmem:[#allocation5 + $0x10] sm:$0xff]   ;;  %s558_s20 = smov [#allocation7]  }
  0x28   :  { %411 = vmatprep.subr.bf16.mxu1 %v556_v0  ;;  %427 = vmatprep.mubr.msk.bf16.mxu1 %vm557_vm0, %v556_v0  ;;  %v47_v5 = vld [vmem:[%s656_s0] sm:$0xf]  ;;  %v463_v7 = vld [vmem:[#allocation5 + $0x18] sm:$0xff]   ;;  %v464_v8 = vld [vmem:[#allocation5 + $0x20] sm:$0xff]   ;;  %s349_s21 = sshll.u32 %s558_s20, 4  ;;  %s350_s21 = int_to_ptr.vmem [resolvable:$true] %s349_s21 }
  0x29   :  { %404 = vmatpush3.bf16.msra.mxu0 %v458_v1  ;;  %412 = vmatpush3.bf16.msra.mxu1 %v460_v3  ;;  %v465_v9 = vld [vmem:[#allocation5 + $0x28] sm:$0xff]   ;;  %v466_v10 = vld [vmem:[#allocation5 + $0x30] sm:$0xff]   ;;  %v467_v11 = vld [vmem:[#allocation5 + $0x38] sm:$0xff]   ;;  %s524_s22 = scalar_lea.vmem %s350_s21, 128  ;;  %p529_p3 = scmp.lt.s32.totalorder %s350_s21, %s350_s21 }
  0x2a   :  { %405 = vmatprep.subr.bf16.mxu0 %v556_v0  ;;  %413 = vmatprep.subr.bf16.mxu1 %v556_v0  ;;  %v468_v12 = vld [vmem:[#allocation5 + $0x40] sm:$0xff]   ;;  %v469_v13 = vld [vmem:[#allocation5 + $0x48] sm:$0xff]   ;;  %v470_v14 = vld [vmem:[#allocation5 + $0x50] sm:$0xff]   ;;  %p525_p2 = scmp.ne.s32.totalorder %s350_s21, %s524_s22  ;;  %p530_p4 = scmp.lt.s32.totalorder %s524_s22, %s524_s22 }
  0x2b   :  { %v471_v15 = vld [vmem:[#allocation5 + $0x58] sm:$0xff]   ;;  %v472_v16 = vld [vmem:[#allocation5 + $0x60] sm:$0xff]   ;;  %v473_v17 = vld [vmem:[#allocation5 + $0x68] sm:$0xff]  }
  0x2c   :  { %v359_v18 = vld [vmem:[%s659_s3] ss:$0 sm:$0xff]  ;;  %v474_v26 = vld [vmem:[#allocation5 + $0x70] sm:$0xff]   ;;  %v475_v27 = vld [vmem:[#allocation5 + $0x78] sm:$0xff]   ;;  %p531_p5 = por %p530_p4, %p529_p3 }
  0x2d   :  { %406 = vmatpush3.bf16.msra.mxu0 %v459_v2  ;;  %414 = vmatpush3.bf16.msra.mxu1 %v461_v4  ;;  %v363_v28 = vld [vmem:[%s659_s3 + $0x1] ss:$0 sm:$0xff]  ;;  %v372_v36 = vld [vmem:[%s659_s3 + $0x2] ss:$0 sm:$0xff] }
  0x2e   :  { %431 = vmatprep.subr.bf16.mxu0 %v556_v0  ;;  %415 = vmatprep.subr.bf16.mxu1 %v556_v0  ;;  %p532_p6 = pnand %p531_p5, %p525_p2 }
  0x30   :  { %408 = vmatmul.mubr.msk.bf16.vlgmr.msra.gmra.mrb[0].mxu0 %vm69_vm1, %v47_v5 }
  0x31   :  { %447 = vmatprep.mubr.msk.bf16.mxu0 %vm557_vm0, %v556_v0  ;;  %416 = vmatpush3.bf16.msra.mxu1 %v462_v6 }
  0x32   :  { %417 = vmatprep.subr.bf16.mxu1 %v556_v0  ;;  %432 = vmatpush3.bf16.msra.mxu0 %v468_v12 }
  0x33   :  { %433 = vmatprep.subr.bf16.mxu0 %v556_v0 }
  0x35   :  { %418 = vmatpush3.bf16.msra.mxu1 %v463_v7 }
  0x36   :  { %419 = vmatprep.subr.bf16.mxu1 %v556_v0  ;;  %434 = vmatpush3.bf16.msra.mxu0 %v469_v13 }
  0x37   :  { %435 = vmatprep.subr.bf16.mxu0 %v556_v0 }
  0x39   :  { %420 = vmatpush3.bf16.msra.mxu1 %v464_v8 }
  0x3a   :  { %421 = vmatprep.subr.bf16.mxu1 %v556_v0  ;;  %436 = vmatpush3.bf16.msra.mxu0 %v470_v14 }
  0x3b   :  { %437 = vmatprep.subr.bf16.mxu0 %v556_v0 }
  0x3d   :  { %422 = vmatpush3.bf16.msra.mxu1 %v465_v9 }
  0x3e   :  { %423 = vmatprep.subr.bf16.mxu1 %v556_v0  ;;  %438 = vmatpush3.bf16.msra.mxu0 %v471_v15 }
  0x3f   :  { %439 = vmatprep.subr.bf16.mxu0 %v556_v0 }
  0x41   :  { %424 = vmatpush3.bf16.msra.mxu1 %v466_v10 }
  0x42   :  { %425 = vmatprep.subr.bf16.mxu1 %v556_v0  ;;  %440 = vmatpush3.bf16.msra.mxu0 %v472_v16 }
  0x43   :  { %441 = vmatprep.subr.bf16.mxu0 %v556_v0 }
  0x45   :  { %426 = vmatpush3.bf16.msra.mxu1 %v467_v11 }
  0x46   :  { %442 = vmatpush3.bf16.msra.mxu0 %v473_v17 }
  0x47   :  { %443 = vmatprep.subr.bf16.mxu0 %v556_v0 }
  0x4a   :  { %444 = vmatpush3.bf16.msra.mxu0 %v474_v26 }
  0x4b   :  { %445 = vmatprep.subr.bf16.mxu0 %v556_v0 }
  0x4e   :  { %446 = vmatpush3.bf16.msra.mxu0 %v475_v27 }
 0x103   :  { %v107_v19 = vpop.f32.mrb[0].mxu0 }
 0x104   :  { %v108_v20 = vadd.f32 %v359_v18, %v107_v19  ;;  %v409_v21 = vpop.f32.mrb[1].mxu0 }
 0x105   :  { %v110_v22 = vpop.f32.mrb[2].mxu0 }
 0x106   :  { %v113_v23 = vmax.f32 %v108_v20, 0.0  ;;  %v410_v24 = vpop.f32.mrb[3].mxu0 }
 0x108   :  { %v114_v25 = vpack.c.bf16 %v113_v23, %v113_v23 }
 0x10a   :  { %428 = vmatmul.mubr.bf16.vlgmr.msra.gmra.mrb[0].mxu1 %v114_v25 }
 0x1dd   :  { %v218_v29 = vpop.f32.mrb[0].mxu1 }
 0x1de   :  { %v219_v30 = vadd.f32 %v363_v28, %v218_v29  ;;  %v429_v31 = vpop.f32.mrb[1].mxu1 }
 0x1df   :  { %v221_v32 = vpop.f32.mrb[2].mxu1 }
 0x1e0   :  { %v224_v33 = vmax.f32 %v219_v30, 0.0  ;;  %v430_v34 = vpop.f32.mrb[3].mxu1 }
 0x1e2   :  { %v225_v35 = vpack.c.bf16 %v224_v33, %v224_v33 }
 0x1e4   :  { %448 = vmatmul.mubr.bf16.vlgmr.msra.gmra.mrb[4].mxu0 %v225_v35 }
 0x2b7   :  { %v330_v37 = vpop.f32.mrb[4].mxu0 }
 0x2b8   :  { %v331_v38 = vadd.f32 %v372_v36, %v330_v37  ;;  %v449_v39 = vpop.f32.mrb[5].mxu0 }
 0x2b9   :  { %v333_v40 = vpop.f32.mrb[6].mxu0 }
 0x2ba   :  { %v381_v41 = vmul.f32 -1.442695, %v331_v38  ;;  %v450_v42 = vpop.f32.mrb[7].mxu0 }
 0x2bc   :  { %476 = vpow2.f32 %v381_v41 }
 0x2c6   :  { %v477_v43 = vpop.eup %476 }
 0x2c7   :  { %v339_v44 = vadd.f32 1.0, %v477_v43 }
 0x2c9   :  { %478 = vrcp.f32 %v339_v44 }
 0x2d3   :  { %v479_v45 = vpop.eup %478 }
 0x2d4   :  { %342 = vst [vmem:[#allocation7] sm:$0xff] %v479_v45 }
 0x2d5   :  { %535 = shalt.err (!%p532_p6)
}
 0x2d6   :  { %s536_s24 = scalar_lea.hbm %s660_s4, 128 }
 0x2d7   :  { %p537_p7 = scmp.ne.s32.totalorder %s660_s4, %s536_s24  ;;  %p540_p8 = scmp.lt.u32.totalorder %s536_s24, %s660_s4 }
 0x2d9   :  { %p542_p9 = pnand %p540_p8, %p537_p7 }
 0x2db   :  { %545 = shalt.err (!%p542_p9)
}
 0x2dc   :  { %352 = dma.vmem_to_hbm [thread:$0]  %s350_s21, 128, %s660_s4, [#allocation4]  }
 0x2dd   :  { %550 = dma.done.wait [#allocation4], 128  }
 0x2de   :  { %551 = vsyncadd [#allocation4], 4294967168 }
 0x2df   :  { %356 = vsyncpa [#allocation3], 1 }
 0x2e0   :  { %357 = vsyncpa [#allocation6], 1 }
 0x2e1   :  { %358 = vsyncpa [#allocation4], 1 }

</bundles_post_ra>
